<compile_context>
chip_gen: v7x
topology: tpu7x:2x2x1
jax: 0.10.0
libtpu: 0.0.40
codegen_flags: <defaults>
</compile_context>

<pallas_src>
import jax
import jax.numpy as jnp
from jax.experimental import pallas as pl
from jax.experimental.pallas import tpu as pltpu

# ------------------------- small model config -------------------------------
D_V = 128            # vision_config.hidden_size
D_T = 128            # text_config.hidden_size
PATCH = 2            # vision_config.patch_size
SMS = 2              # spatial_merge_size
IMG_SIZE = 16        # vision_config.image_size (H == W)
VOCAB = 64
IMAGE_TOKEN_INDEX = 10
RMS_EPS = 1e-5
SEQ_TILE = 8         # sequence tile for the merge kernel grid

N_PATCH_SIDE = IMG_SIZE // PATCH                 # 8
N_PATCHES = N_PATCH_SIDE * N_PATCH_SIDE          # 64
N_BLOCKS = (N_PATCH_SIDE // SMS) ** 2            # 16 merged image tokens
PATCH_FEAT = 3 * PATCH * PATCH                   # 12
KPOS = SMS * SMS                                 # 4 kernel positions per block


def _full_spec(shape):
    n = len(shape)
    return pl.BlockSpec(shape, lambda *_, n=n: (0,) * n)


# ---------------- kernel 1: vision tower + multi-modal projector ------------
def _vision_projector_kernel(patches_ref, wpe_ref, ln_pre_ref, pnorm_ref,
                             merge_ref, l1w_ref, l1b_ref, l2w_ref, l2b_ref,
                             out_ref):
    f32 = jnp.float32
    bf16 = jnp.bfloat16

    # patch-embedding conv as a matmul (bf16 MXU, f32 acc)
    # TODO(synk): K=PATCH_FEAT=12 under-fills the MXU at toy size; at real
    # Pixtral patch_size=16 (K=768) this would be tiled in multiples of 128.
    feats = jnp.dot(patches_ref[...], wpe_ref[...],
                    preferred_element_type=f32)                  # (64, 128) f32

    # fused ln_pre RMSNorm + projector RMSNorm (f32 VPU/EUP)
    var = jnp.mean(feats * feats, axis=-1, keepdims=True)
    feats = feats * jax.lax.rsqrt(var + RMS_EPS) * ln_pre_ref[...]
    # TODO(synk): Pixtral transformer encoder layers skipped (identity).
    var = jnp.mean(feats * feats, axis=-1, keepdims=True)
    feats = feats * jax.lax.rsqrt(var + RMS_EPS) * pnorm_ref[...]

    # Mistral3PatchMerger as ONE deeper-K matmul:
    #   rows of feats are ordered (kernel-pos k, block b); slice the 4
    #   sublane-aligned 16-row groups (stays in registers, no VMEM scratch)
    #   and lane-concat them -> (N_BLOCKS, 4*D_V); merge weight is
    #   pre-concatenated (k, c)-ordered at init time.
    fb = feats.astype(bf16)
    lhs = jnp.concatenate(
        [fb[k * N_BLOCKS:(k + 1) * N_BLOCKS, :] for k in range(KPOS)],
        axis=1)                                                  # (16, 512)
    merged = jnp.dot(lhs, merge_ref[...],
                     preferred_element_type=f32)                 # (16, 128)

    # projector MLP: linear_1 -> GELU -> linear_2
    h = jnp.dot(merged.astype(bf16), l1w_ref[...],
                preferred_element_type=f32) + l1b_ref[...]
    # TODO(synk): tanh-approx GELU (PyTorch nn.GELU default is exact erf).
    h = jax.nn.gelu(h, approximate=True)
    img = jnp.dot(h.astype(bf16), l2w_ref[...],
                  preferred_element_type=f32) + l2b_ref[...]     # (16, 128)

    out_ref[...] = img.astype(out_ref.dtype)


# ---------------- kernel 2: merge multimodal embeddings (seq-tiled) ----------
def _merge_kernel(ids_ref, slot_ref, text_ref, img_ref, out_ref):
    f32 = jnp.float32
    bf16 = jnp.bfloat16
    t = ids_ref.shape[0]

    ids = ids_ref[...]                                           # (T, 1) i32
    slot = slot_ref[...]                                         # (T, 1) i32
    is_img = ids == IMAGE_TOKEN_INDEX                            # (T, 1) bool

    # tiny in-order scatter of image embeddings: bf16 one-hot (0/1 exact),
    # full MXU rate, f32 accumulation.
    block_iota = jax.lax.broadcasted_iota(jnp.int32, (t, N_BLOCKS), 1)
    sel = (slot == block_iota).astype(bf16)                      # (T, 16)
    img_g = jnp.dot(sel, img_ref[...],
                    preferred_element_type=f32)                  # (T, D_T)

    out_ref[...] = jnp.where(is_img, img_g.astype(bf16), text_ref[...])


# ------------------------------ parameters -----------------------------------
def init_params(key):
    """Generate torch-layout weights, then convert ONCE to kernel layouts."""
    ks = jax.random.split(key, 8)
    scale = 0.02

    # torch layouts
    patch_conv_w = scale * jax.random.normal(ks[0], (D_V, 3, PATCH, PATCH), jnp.float32)
    ln_pre_w = 1.0 + scale * jax.random.normal(ks[1], (D_V,), jnp.float32)
    proj_norm_w = 1.0 + scale * jax.random.normal(ks[2], (D_V,), jnp.float32)
    merge_w = scale * jax.random.normal(ks[3], (D_V, D_V * KPOS), jnp.float32)
    l1_w = scale * jax.random.normal(ks[4], (D_T, D_V), jnp.float32)
    l1_b = scale * jax.random.normal(ks[5], (D_T,), jnp.float32)
    l2_w = scale * jax.random.normal(ks[6], (D_T, D_T), jnp.float32)
    l2_b = scale * jax.random.normal(ks[7], (D_T,), jnp.float32)
    embed = scale * jax.random.normal(jax.random.fold_in(key, 99),
                                      (VOCAB, D_T), jnp.float32)

    # kernel layouts (pre-transposed / pre-permuted, bf16 for MXU operands)
    # merge_w_cat[k*D_V + c, o] = merge_w[o, c*s*s + k]
    # (torch unfold column order is (c, di, dj); our concatenated LHS is (k, c)).
    merge_w_cat = jnp.transpose(
        merge_w.reshape(D_V, D_V, KPOS), (2, 1, 0)).reshape(KPOS * D_V, D_V)

    return {
        "w_pe_t": patch_conv_w.reshape(D_V, PATCH_FEAT).T.astype(jnp.bfloat16),
        "ln_pre_w": ln_pre_w.reshape(1, D_V).astype(jnp.float32),
        "proj_norm_w": proj_norm_w.reshape(1, D_V).astype(jnp.float32),
        "merge_w_cat": merge_w_cat.astype(jnp.bfloat16),     # (4*D_V, D_V)
        "l1_wt": l1_w.T.astype(jnp.bfloat16),                # (D_V, D_T)
        "l1_b": l1_b.reshape(1, D_T).astype(jnp.float32),
        "l2_wt": l2_w.T.astype(jnp.bfloat16),                # (D_T, D_T)
        "l2_b": l2_b.reshape(1, D_T).astype(jnp.float32),
        "embed": embed.astype(jnp.bfloat16),                  # (VOCAB, D_T) HBM
    }


# ------------------------------ forward ---------------------------------------
def forward(params, input_ids, pixel_values):
    n_img, C, H, W = pixel_values.shape
    p, s = PATCH, SMS
    h, w = H // p, W // p

    # Unfold pixels into per-patch rows ordered (kernel-pos (di,dj), block (bi,bj)),
    # per-patch features ordered (c, kh, kw).  Pure layout plumbing, done once
    # outside the kernel; cast to bf16 (halves the HBM->VMEM DMA).
    x = pixel_values.reshape(n_img, C, h // s, s, p, w // s, s, p)
    x = x.transpose(0, 3, 6, 2, 5, 1, 4, 7)   # (n, di, dj, bi, bj, c, kh, kw)
    patches = x.reshape(n_img * s * s * (h // s) * (w // s),
                        C * p * p).astype(jnp.bfloat16)

    # --- kernel 1: vision tower + projector -> image embeddings (bf16) -------
    vp_args = (patches, params["w_pe_t"], params["ln_pre_w"],
               params["proj_norm_w"], params["merge_w_cat"],
               params["l1_wt"], params["l1_b"], params["l2_wt"], params["l2_b"])
    img_embeds = pl.pallas_call(
        _vision_projector_kernel,
        out_shape=jax.ShapeDtypeStruct((N_BLOCKS, D_T), jnp.bfloat16),
        grid=(1,),
        in_specs=[_full_spec(a.shape) for a in vp_args],
        out_specs=_full_spec((N_BLOCKS, D_T)),
        compiler_params=pltpu.CompilerParams(
            dimension_semantics=("arbitrary",)),
    )(*vp_args)

    # --- text-token embeddings: real gather, table stays in HBM --------------
    seq = input_ids.shape[0]
    ids32 = input_ids.astype(jnp.int32)
    text_emb = jnp.take(params["embed"], ids32, axis=0)          # (seq, D_T) bf16

    is_img = (ids32 == IMAGE_TOKEN_INDEX).astype(jnp.int32)
    slot = (jnp.cumsum(is_img) - 1).astype(jnp.int32)            # in-order slot

    ids_col = ids32.reshape(seq, 1)
    slot_col = slot.reshape(seq, 1)

    # --- kernel 2: merge_multimodal_embeddings, seq-tiled, parallel grid -----
    assert seq % SEQ_TILE == 0
    inputs_embeds = pl.pallas_call(
        _merge_kernel,
        out_shape=jax.ShapeDtypeStruct((seq, D_T), jnp.bfloat16),
        grid=(seq // SEQ_TILE,),
        in_specs=[
            pl.BlockSpec((SEQ_TILE, 1), lambda i: (i, 0)),
            pl.BlockSpec((SEQ_TILE, 1), lambda i: (i, 0)),
            pl.BlockSpec((SEQ_TILE, D_T), lambda i: (i, 0)),
            pl.BlockSpec((N_BLOCKS, D_T), lambda i: (0, 0)),
        ],
        out_specs=pl.BlockSpec((SEQ_TILE, D_T), lambda i: (i, 0)),
        compiler_params=pltpu.CompilerParams(
            dimension_semantics=("parallel",)),
    )(ids_col, slot_col, text_emb, img_embeds)

    # TODO(synk): Mistral decoder (language_model.model) not implemented;
    # returning the merged inputs_embeds that would be passed to it.
    return inputs_embeds


# ------------------------------ main ------------------------------------------
if __name__ == "__main__":
    key = jax.random.PRNGKey(0)
    params = init_params(key)

    # 1 image, 3x16x16 -> 8x8 patches -> 64 vision tokens -> 16 merged tokens
    pixel_values = jax.random.normal(jax.random.fold_in(key, 1),
                                     (1, 3, IMG_SIZE, IMG_SIZE), jnp.float32)

    n_image_tokens = N_BLOCKS                                   # 16
    input_ids = jnp.array([1, 2, 3, 4]
                          + [IMAGE_TOKEN_INDEX] * n_image_tokens
                          + [5, 6, 7, 8], dtype=jnp.int32)      # seq = 24

    fwd = jax.jit(forward)
    out = fwd(params, input_ids, pixel_values)
    jax.block_until_ready(out)
    assert out.shape == (input_ids.shape[0], D_T)
    assert bool(jnp.all(jnp.isfinite(out.astype(jnp.float32))))
    print("KERNEL_OK")
</pallas_src>

<mosaic_0001>
module attributes {stable_mosaic.version = 11 : i64} {
  func.func @_vision_projector_kernel(%arg0: i32, %arg1: memref<64x12xbf16, #tpu.memory_space<vmem>>, %arg2: memref<12x128xbf16, #tpu.memory_space<vmem>>, %arg3: memref<1x128xf32, #tpu.memory_space<vmem>>, %arg4: memref<1x128xf32, #tpu.memory_space<vmem>>, %arg5: memref<512x128xbf16, #tpu.memory_space<vmem>>, %arg6: memref<128x128xbf16, #tpu.memory_space<vmem>>, %arg7: memref<1x128xf32, #tpu.memory_space<vmem>>, %arg8: memref<128x128xbf16, #tpu.memory_space<vmem>>, %arg9: memref<1x128xf32, #tpu.memory_space<vmem>>, %arg10: memref<16x128xbf16, #tpu.memory_space<vmem>>) attributes {dimension_semantics = [#tpu.dimension_semantics<arbitrary>], iteration_bounds = array<i64: 1>, scalar_prefetch = 0 : i64, scratch_operands = 0 : i64, tpu.core_type = #tpu.core_type<tc>, window_params = [{pipeline_mode = #tpu.pipeline_mode<synchronous>, transform_indices = @transform_0, window_bounds = array<i64: 64, 12>}, {pipeline_mode = #tpu.pipeline_mode<synchronous>, transform_indices = @transform_1, window_bounds = array<i64: 12, 128>}, {pipeline_mode = #tpu.pipeline_mode<synchronous>, transform_indices = @transform_2, window_bounds = array<i64: 1, 128>}, {pipeline_mode = #tpu.pipeline_mode<synchronous>, transform_indices = @transform_3, window_bounds = array<i64: 1, 128>}, {pipeline_mode = #tpu.pipeline_mode<synchronous>, transform_indices = @transform_4, window_bounds = array<i64: 512, 128>}, {pipeline_mode = #tpu.pipeline_mode<synchronous>, transform_indices = @transform_5, window_bounds = array<i64: 128, 128>}, {pipeline_mode = #tpu.pipeline_mode<synchronous>, transform_indices = @transform_6, window_bounds = array<i64: 1, 128>}, {pipeline_mode = #tpu.pipeline_mode<synchronous>, transform_indices = @transform_7, window_bounds = array<i64: 128, 128>}, {pipeline_mode = #tpu.pipeline_mode<synchronous>, transform_indices = @transform_8, window_bounds = array<i64: 1, 128>}, {pipeline_mode = #tpu.pipeline_mode<synchronous>, transform_indices = @transform_9, window_bounds = array<i64: 16, 128>}]} {
    %c0 = arith.constant 0 : index
    %c0_0 = arith.constant 0 : index
    %0 = vector.load %arg1[%c0, %c0_0] : memref<64x12xbf16, #tpu.memory_space<vmem>>, vector<64x12xbf16>
    %c0_1 = arith.constant 0 : index
    %c0_2 = arith.constant 0 : index
    %1 = vector.load %arg2[%c0_1, %c0_2] : memref<12x128xbf16, #tpu.memory_space<vmem>>, vector<12x128xbf16>
    %cst = arith.constant dense<0.000000e+00> : vector<64x128xf32>
    %2 = tpu.matmul %0, %1, %cst {dimension_numbers = #tpu.dot_dimension_numbers<[1], [0], [0], [1], [0, 0, 1, 1], [], []>} : vector<64x12xbf16>, vector<12x128xbf16>, vector<64x128xf32> -> vector<64x128xf32>
    %3 = arith.mulf %2, %2 : vector<64x128xf32>
    %cst_3 = arith.constant dense<0.000000e+00> : vector<64xf32>
    %4 = vector.multi_reduction <add>, %3, %cst_3 [1] : vector<64x128xf32> to vector<64xf32>
    %5 = vector.shape_cast %4 : vector<64xf32> to vector<64x1xf32>
    %cst_4 = arith.constant 1.280000e+02 : f32
    %6 = vector.broadcast %cst_4 : f32 to vector<64x1xf32>
    %7 = arith.divf %5, %6 : vector<64x1xf32>
    %cst_5 = arith.constant 9.99999974E-6 : f32
    %8 = vector.broadcast %cst_5 : f32 to vector<64x1xf32>
    %9 = arith.addf %7, %8 : vector<64x1xf32>
    %10 = math.rsqrt %9 : vector<64x1xf32>
    %11 = vector.broadcast %10 : vector<64x1xf32> to vector<64x128xf32>
    %12 = arith.mulf %2, %11 : vector<64x128xf32>
    %c0_6 = arith.constant 0 : index
    %c0_7 = arith.constant 0 : index
    %13 = vector.load %arg3[%c0_6, %c0_7] : memref<1x128xf32, #tpu.memory_space<vmem>>, vector<1x128xf32>
    %14 = vector.broadcast %13 : vector<1x128xf32> to vector<64x128xf32>
    %15 = arith.mulf %12, %14 : vector<64x128xf32>
    %16 = arith.mulf %15, %15 : vector<64x128xf32>
    %cst_8 = arith.constant dense<0.000000e+00> : vector<64xf32>
    %17 = vector.multi_reduction <add>, %16, %cst_8 [1] : vector<64x128xf32> to vector<64xf32>
    %18 = vector.shape_cast %17 : vector<64xf32> to vector<64x1xf32>
    %cst_9 = arith.constant 1.280000e+02 : f32
    %19 = vector.broadcast %cst_9 : f32 to vector<64x1xf32>
    %20 = arith.divf %18, %19 : vector<64x1xf32>
    %cst_10 = arith.constant 9.99999974E-6 : f32
    %21 = vector.broadcast %cst_10 : f32 to vector<64x1xf32>
    %22 = arith.addf %20, %21 : vector<64x1xf32>
    %23 = math.rsqrt %22 : vector<64x1xf32>
    %24 = vector.broadcast %23 : vector<64x1xf32> to vector<64x128xf32>
    %25 = arith.mulf %15, %24 : vector<64x128xf32>
    %c0_11 = arith.constant 0 : index
    %c0_12 = arith.constant 0 : index
    %26 = vector.load %arg4[%c0_11, %c0_12] : memref<1x128xf32, #tpu.memory_space<vmem>>, vector<1x128xf32>
    %27 = vector.broadcast %26 : vector<1x128xf32> to vector<64x128xf32>
    %28 = arith.mulf %25, %27 : vector<64x128xf32>
    %29 = arith.truncf %28 : vector<64x128xf32> to vector<64x128xbf16>
    %30 = vector.extract_strided_slice %29 {offsets = [0, 0], sizes = [16, 128], strides = [1, 1]} : vector<64x128xbf16> to vector<16x128xbf16>
    %31 = vector.extract_strided_slice %29 {offsets = [16, 0], sizes = [16, 128], strides = [1, 1]} : vector<64x128xbf16> to vector<16x128xbf16>
    %32 = vector.extract_strided_slice %29 {offsets = [32, 0], sizes = [16, 128], strides = [1, 1]} : vector<64x128xbf16> to vector<16x128xbf16>
    %33 = vector.extract_strided_slice %29 {offsets = [48, 0], sizes = [16, 128], strides = [1, 1]} : vector<64x128xbf16> to vector<16x128xbf16>
    %34 = tpu.concatenate %30, %31, %32, %33 in 1 : vector<16x128xbf16>, vector<16x128xbf16>, vector<16x128xbf16>, vector<16x128xbf16> -> vector<16x512xbf16>
    %c0_13 = arith.constant 0 : index
    %c0_14 = arith.constant 0 : index
    %35 = vector.load %arg5[%c0_13, %c0_14] : memref<512x128xbf16, #tpu.memory_space<vmem>>, vector<512x128xbf16>
    %cst_15 = arith.constant dense<0.000000e+00> : vector<16x128xf32>
    %36 = tpu.matmul %34, %35, %cst_15 {dimension_numbers = #tpu.dot_dimension_numbers<[1], [0], [0], [1], [0, 0, 1, 1], [], []>} : vector<16x512xbf16>, vector<512x128xbf16>, vector<16x128xf32> -> vector<16x128xf32>
    %37 = arith.truncf %36 : vector<16x128xf32> to vector<16x128xbf16>
    %c0_16 = arith.constant 0 : index
    %c0_17 = arith.constant 0 : index
    %38 = vector.load %arg6[%c0_16, %c0_17] : memref<128x128xbf16, #tpu.memory_space<vmem>>, vector<128x128xbf16>
    %cst_18 = arith.constant dense<0.000000e+00> : vector<16x128xf32>
    %39 = tpu.matmul %37, %38, %cst_18 {dimension_numbers = #tpu.dot_dimension_numbers<[1], [0], [0], [1], [0, 0, 1, 1], [], []>} : vector<16x128xbf16>, vector<128x128xbf16>, vector<16x128xf32> -> vector<16x128xf32>
    %c0_19 = arith.constant 0 : index
    %c0_20 = arith.constant 0 : index
    %40 = vector.load %arg7[%c0_19, %c0_20] : memref<1x128xf32, #tpu.memory_space<vmem>>, vector<1x128xf32>
    %41 = vector.broadcast %40 : vector<1x128xf32> to vector<16x128xf32>
    %42 = arith.addf %39, %41 : vector<16x128xf32>
    %43 = arith.mulf %42, %42 : vector<16x128xf32>
    %44 = arith.mulf %42, %43 : vector<16x128xf32>
    %cst_21 = arith.constant 4.471500e-02 : f32
    %45 = vector.broadcast %cst_21 : f32 to vector<16x128xf32>
    %46 = arith.mulf %45, %44 : vector<16x128xf32>
    %47 = arith.addf %42, %46 : vector<16x128xf32>
    %cst_22 = arith.constant 0.797884583 : f32
    %48 = vector.broadcast %cst_22 : f32 to vector<16x128xf32>
    %49 = arith.mulf %48, %47 : vector<16x128xf32>
    %50 = math.tanh %49 : vector<16x128xf32>
    %cst_23 = arith.constant 1.000000e+00 : f32
    %51 = vector.broadcast %cst_23 : f32 to vector<16x128xf32>
    %52 = arith.addf %51, %50 : vector<16x128xf32>
    %cst_24 = arith.constant 5.000000e-01 : f32
    %53 = vector.broadcast %cst_24 : f32 to vector<16x128xf32>
    %54 = arith.mulf %53, %52 : vector<16x128xf32>
    %55 = arith.mulf %42, %54 : vector<16x128xf32>
    %56 = arith.truncf %55 : vector<16x128xf32> to vector<16x128xbf16>
    %c0_25 = arith.constant 0 : index
    %c0_26 = arith.constant 0 : index
    %57 = vector.load %arg8[%c0_25, %c0_26] : memref<128x128xbf16, #tpu.memory_space<vmem>>, vector<128x128xbf16>
    %cst_27 = arith.constant dense<0.000000e+00> : vector<16x128xf32>
    %58 = tpu.matmul %56, %57, %cst_27 {dimension_numbers = #tpu.dot_dimension_numbers<[1], [0], [0], [1], [0, 0, 1, 1], [], []>} : vector<16x128xbf16>, vector<128x128xbf16>, vector<16x128xf32> -> vector<16x128xf32>
    %c0_28 = arith.constant 0 : index
    %c0_29 = arith.constant 0 : index
    %59 = vector.load %arg9[%c0_28, %c0_29] : memref<1x128xf32, #tpu.memory_space<vmem>>, vector<1x128xf32>
    %60 = vector.broadcast %59 : vector<1x128xf32> to vector<16x128xf32>
    %61 = arith.addf %58, %60 : vector<16x128xf32>
    %62 = arith.truncf %61 : vector<16x128xf32> to vector<16x128xbf16>
    %c0_30 = arith.constant 0 : index
    %c0_31 = arith.constant 0 : index
    %63 = vector.load %arg10[%c0_30, %c0_31] : memref<16x128xbf16, #tpu.memory_space<vmem>>, vector<16x128xbf16>
    tpu.vector_store %arg10[%c0_30, %c0_31], %62 {strides = array<i32>} : memref<16x128xbf16, #tpu.memory_space<vmem>>, vector<16x128xbf16>,
    return
  }
  func.func @transform_0(%arg0: i32) -> (i32, i32) {
    %c0_i32 = arith.constant 0 : i32
    %c0_i32_0 = arith.constant 0 : i32
    %c0_i32_1 = arith.constant 0 : i32
    return %c0_i32, %c0_i32_0 : i32, i32
  }
  func.func @transform_1(%arg0: i32) -> (i32, i32) {
    %c0_i32 = arith.constant 0 : i32
    %c0_i32_0 = arith.constant 0 : i32
    %c0_i32_1 = arith.constant 0 : i32
    return %c0_i32, %c0_i32_0 : i32, i32
  }
  func.func @transform_2(%arg0: i32) -> (i32, i32) {
    %c0_i32 = arith.constant 0 : i32
    %c0_i32_0 = arith.constant 0 : i32
    %c0_i32_1 = arith.constant 0 : i32
    return %c0_i32, %c0_i32_0 : i32, i32
  }
  func.func @transform_3(%arg0: i32) -> (i32, i32) {
    %c0_i32 = arith.constant 0 : i32
    %c0_i32_0 = arith.constant 0 : i32
    %c0_i32_1 = arith.constant 0 : i32
    return %c0_i32, %c0_i32_0 : i32, i32
  }
  func.func @transform_4(%arg0: i32) -> (i32, i32) {
    %c0_i32 = arith.constant 0 : i32
    %c0_i32_0 = arith.constant 0 : i32
    %c0_i32_1 = arith.constant 0 : i32
    return %c0_i32, %c0_i32_0 : i32, i32
  }
  func.func @transform_5(%arg0: i32) -> (i32, i32) {
    %c0_i32 = arith.constant 0 : i32
    %c0_i32_0 = arith.constant 0 : i32
    %c0_i32_1 = arith.constant 0 : i32
    return %c0_i32, %c0_i32_0 : i32, i32
  }
  func.func @transform_6(%arg0: i32) -> (i32, i32) {
    %c0_i32 = arith.constant 0 : i32
    %c0_i32_0 = arith.constant 0 : i32
    %c0_i32_1 = arith.constant 0 : i32
    return %c0_i32, %c0_i32_0 : i32, i32
  }
  func.func @transform_7(%arg0: i32) -> (i32, i32) {
    %c0_i32 = arith.constant 0 : i32
    %c0_i32_0 = arith.constant 0 : i32
    %c0_i32_1 = arith.constant 0 : i32
    return %c0_i32, %c0_i32_0 : i32, i32
  }
  func.func @transform_8(%arg0: i32) -> (i32, i32) {
    %c0_i32 = arith.constant 0 : i32
    %c0_i32_0 = arith.constant 0 : i32
    %c0_i32_1 = arith.constant 0 : i32
    return %c0_i32, %c0_i32_0 : i32, i32
  }
  func.func @transform_9(%arg0: i32) -> (i32, i32) {
    %c0_i32 = arith.constant 0 : i32
    %c0_i32_0 = arith.constant 0 : i32
    %c0_i32_1 = arith.constant 0 : i32
    return %c0_i32, %c0_i32_0 : i32, i32
  }
}

module attributes {stable_mosaic.version = 11 : i64} {
  func.func @_merge_kernel(%arg0: i32, %arg1: memref<8x1xi32, #tpu.memory_space<vmem>>, %arg2: memref<8x1xi32, #tpu.memory_space<vmem>>, %arg3: memref<8x128xbf16, #tpu.memory_space<vmem>>, %arg4: memref<16x128xbf16, #tpu.memory_space<vmem>>, %arg5: memref<8x128xbf16, #tpu.memory_space<vmem>>) attributes {dimension_semantics = [#tpu.dimension_semantics<parallel>], iteration_bounds = array<i64: 3>, scalar_prefetch = 0 : i64, scratch_operands = 0 : i64, tpu.core_type = #tpu.core_type<tc>, window_params = [{transform_indices = @transform_0, window_bounds = array<i64: 8, 1>}, {transform_indices = @transform_1, window_bounds = array<i64: 8, 1>}, {transform_indices = @transform_2, window_bounds = array<i64: 8, 128>}, {pipeline_mode = #tpu.pipeline_mode<synchronous>, transform_indices = @transform_3, window_bounds = array<i64: 16, 128>}, {transform_indices = @transform_4, window_bounds = array<i64: 8, 128>}]} {
    %c0 = arith.constant 0 : index
    %c0_0 = arith.constant 0 : index
    %0 = vector.load %arg1[%c0, %c0_0] : memref<8x1xi32, #tpu.memory_space<vmem>>, vector<8x1xi32>
    %c0_1 = arith.constant 0 : index
    %c0_2 = arith.constant 0 : index
    %1 = vector.load %arg2[%c0_1, %c0_2] : memref<8x1xi32, #tpu.memory_space<vmem>>, vector<8x1xi32>
    %c10_i32 = arith.constant 10 : i32
    %2 = vector.broadcast %c10_i32 : i32 to vector<8x1xi32>
    %3 = arith.cmpi eq, %0, %2 : vector<8x1xi32>
    %4 = tpu.iota {dimensions = array<i32: 1>} : vector<8x16xi32>
    %5 = vector.broadcast %1 : vector<8x1xi32> to vector<8x16xi32>
    %6 = arith.cmpi eq, %5, %4 : vector<8x16xi32>
    %7 = arith.extui %6 : vector<8x16xi1> to vector<8x16xi32>
    %8 = arith.sitofp %7 : vector<8x16xi32> to vector<8x16xf32>
    %9 = arith.truncf %8 : vector<8x16xf32> to vector<8x16xbf16>
    %c0_3 = arith.constant 0 : index
    %c0_4 = arith.constant 0 : index
    %10 = vector.load %arg4[%c0_3, %c0_4] : memref<16x128xbf16, #tpu.memory_space<vmem>>, vector<16x128xbf16>
    %cst = arith.constant dense<0.000000e+00> : vector<8x128xf32>
    %11 = tpu.matmul %9, %10, %cst {dimension_numbers = #tpu.dot_dimension_numbers<[1], [0], [0], [1], [0, 0, 1, 1], [], []>} : vector<8x16xbf16>, vector<16x128xbf16>, vector<8x128xf32> -> vector<8x128xf32>
    %12 = arith.truncf %11 : vector<8x128xf32> to vector<8x128xbf16>
    %c0_5 = arith.constant 0 : index
    %c0_6 = arith.constant 0 : index
    %13 = vector.load %arg3[%c0_5, %c0_6] : memref<8x128xbf16, #tpu.memory_space<vmem>>, vector<8x128xbf16>
    %14 = vector.shape_cast %3 : vector<8x1xi1> to vector<8x1xi1>
    %15 = vector.broadcast %14 : vector<8x1xi1> to vector<8x128xi1>
    %16 = arith.select %15, %12, %13 : vector<8x128xi1>, vector<8x128xbf16>
    %c0_7 = arith.constant 0 : index
    %c0_8 = arith.constant 0 : index
    %17 = vector.load %arg5[%c0_7, %c0_8] : memref<8x128xbf16, #tpu.memory_space<vmem>>, vector<8x128xbf16>
    tpu.vector_store %arg5[%c0_7, %c0_8], %16 {strides = array<i32>} : memref<8x128xbf16, #tpu.memory_space<vmem>>, vector<8x128xbf16>,
    return
  }
  func.func @transform_0(%arg0: i32) -> (i32, i32) {
    %c0_i32 = arith.constant 0 : i32
    %c0_i32_0 = arith.constant 0 : i32
    return %arg0, %c0_i32 : i32, i32
  }
  func.func @transform_1(%arg0: i32) -> (i32, i32) {
    %c0_i32 = arith.constant 0 : i32
    %c0_i32_0 = arith.constant 0 : i32
    return %arg0, %c0_i32 : i32, i32
  }
  func.func @transform_2(%arg0: i32) -> (i32, i32) {
    %c0_i32 = arith.constant 0 : i32
    %c0_i32_0 = arith.constant 0 : i32
    return %arg0, %c0_i32 : i32, i32
  }
  func.func @transform_3(%arg0: i32) -> (i32, i32) {
    %c0_i32 = arith.constant 0 : i32
    %c0_i32_0 = arith.constant 0 : i32
    %c0_i32_1 = arith.constant 0 : i32
    return %c0_i32, %c0_i32_0 : i32, i32
  }
  func.func @transform_4(%arg0: i32) -> (i32, i32) {
    %c0_i32 = arith.constant 0 : i32
    %c0_i32_0 = arith.constant 0 : i32
    return %arg0, %c0_i32 : i32, i32
  }
}

</mosaic_0001>

<bundles_post_ra>
// kernel: forward.3
= control target key start
LH: loop header
LB: loop body
LE: loop exit
PB: predicated region body
PF: predicated region fallthrough
CT: control target
= control target key end

     0   :  { %9 = vsyncpa [#allocation3], 0  ;;  %s668_s0 = inlined_call_operand.vmem [shape: s32[24,1], index: 0, kind: input, shape index: {}]   ;;  %s669_s1 = inlined_call_operand.vmem [shape: s32[24,1], index: 1, kind: input, shape index: {}]   ;;  %s670_s2 = inlined_call_operand.vmem [shape: bf16[24,128], index: 2, kind: input, shape index: {}]   ;;  %s671_s3 = inlined_call_operand.vmem [shape: bf16[16,128], index: 3, kind: input, shape index: {}]   ;;  %s672_s4 = inlined_call_operand.hbm [shape: bf16[24,128], index: 4, kind: output, shape index: {}]  }
   0x1   :  { %11 = vsyncpa [#allocation3 + $0x1], 0  ;;  %s559_s15 = smov 0   ;;  %s561_s16 = smov 0  }
   0x2   :  { %s563_s17 = smov 0   ;;  %s565_s18 = smov 0  }
   0x3 LB: > { %s580_s19 = sadd.s32 4294967295, %s528_s18   ;;  %s399_s20 = sadd.s32 4294967294, %s528_s18   ;;  %s528_s18 = sphi %s565_s18, %s678_s18   ;;  %s524_s17 = sphi %s563_s17, %s677_s17   ;;  %s520_s16 = sphi %s561_s16, %s676_s16   ;;  %s516_s15 = sphi %s559_s15, %s675_s15  }
   0x4   : > { %s584_s21 = sadd.s32 1, %s528_s18   ;;  %s123_s22 = sadd.s32 1, %s524_s17 }
   0x5   : > { %s120_s23 = ssub.s32 %s528_s18, %s584_s21  ;;  %p133_p0 = scmp.ne.s32.totalorder %s524_s17, %s520_s16 }
   0x6   : > { %p121_p1 = scmp.eq.s32.totalorder %s120_s23, 0  ;;  %p134_p2 = scmp.eq.s32.totalorder %s580_s19, 2 }
   0x7   : > { %p139_p3 = scmp.ne.s32.totalorder %s520_s16, %s516_s15  ;;  %p140_p4 = scmp.eq.s32.totalorder %s399_s20, 2 }
   0x8   : > { %s595_s24 = scalar_select %p121_p1, %s524_s17, %s123_s22  }
   0x9   : > { %p597_p5 = por %p134_p2, %p133_p0  ;;  %p601_p6 = por %p140_p4, %p139_p3 }
   0xa   : > { %p402_p7 = scmp.ge.s32.totalorder %s528_s18, 1  ;;  %p182_p8 = scmp.lt.s32.totalorder %s528_s18, 4 }
   0xc   : > { %p183_p9 = pnand %p402_p7, %p182_p8 }
   0xd   : > { %p215_p10 = scmp.lt.s32.totalorder (!%p183_p9), %s580_s19, 2  ;;  %v530_v0 = vmov (!%p183_p9), 0   ;;  %v531_v1 = vmov (!%p183_p9), 0.0   ;;  %v465_v4 = vld [vmem:[%s671_s3] sm:$0xff] (!%p183_p9)   ;;  %vm532_vm1 = vmmov (!%p183_p9), 0   ;;  %v231_v6 = vlaneseq (!%p183_p9)  ;;  %s212_s11 = sand.u32 (!%p183_p9), 1, %s520_s16  }
   0xe   : > { %186 = sbr.rel (%p183_p9) target bundleno = 388 (0x184), region = 36  ;;  %464 = vset.pattern.permute.xlu0 (!%p183_p9), %v530_v0  ;;  %416 = vmatprep.subr.bf16.mxu0 (!%p183_p9), %v531_v1  ;;  %vm248_vm3 = vcmask (!%p183_p9), 130048   ;;  %s403_s12 = sshll.u32 (!%p183_p9), %s212_s11, 2 }
   0xf   : > { %417 = vmatpush3.bf16.msra.mxu0 (!%p183_p9), %v465_v4  ;;  %418 = vmatprep.mubr.msk.bf16.mxu0 (!%p183_p9), %vm532_vm1, %v531_v1  ;;  %v232_v7 = vand.u32 (!%p183_p9), 127, %v231_v6  ;;  %s411_s23 = sshll.u32 (!%p183_p9), %s580_s19, 6  ;;  %s533_s7 = smov (!%p183_p9), [#allocation2]  }
  0x15   : > { %s216_s27 = scalar_select %p215_p10, %s580_s19, 2 }
  0x16   : > { %s303_s19 = scalar_lea.sflag [#allocation3], %s212_s11 }
  0x17   : > { %s404_s28 = sshll.u32 %s216_s27, 3  ;;  %s406_s13 = sshll.u32 %s216_s27, 2 }
  0x18   : > { %s218_s5 = scalar_lea.vmem %s668_s0, %s404_s28  ;;  %s222_s8 = scalar_lea.vmem %s669_s1, %s404_s28 }
  0x19   : > { %v228_v2 = vld [vmem:[%s218_s5] sm:$0xff]  ;;  %s226_s22 = scalar_lea.vmem %s670_s2, %s406_s13  ;;  %s214_s28 = scalar_lea.vmem [#allocation2], %s403_s12 }
  0x1a   : > { %v229_v3 = vld [vmem:[%s222_s8] sm:$0xff]  ;;  %vm230_vm0 = vcmp.eq.s32.totalorder %v228_v2, 10  ;;  %s316_s29 = sshll.u32 %s214_s28, 4  ;;  %s626_s27 = scalar_lea.hbm %s672_s4, %s411_s23  ;;  %s628_s29 = int_to_ptr.vmem [resolvable:$true] %s316_s29 }
  0x1b   : > { %234 = vperm.xlu0 %464, %v229_v3   ;;  %v294_v5 = vsel %vm230_vm0, 1, %v530_v0  ;;  %v293_v13 = vld [vmem:[%s226_s22] sm:$0xf]  ;;  %s466_s6 = scalar_lea.vmem %s628_s29, 64  ;;  %s470_s8 = sshll.u32 %s533_s7, 4  ;;  %s471_s8 = int_to_ptr.vmem [resolvable:$false] %s470_s8 }
  0x1c   : > { %p467_p11 = scmp.ne.s32.totalorder %s628_s29, %s466_s6  ;;  %s472_s9 = scalar_lea.vmem %s471_s8, 128 }
  0x1d   : > { %p473_p0 = scmp.lt.s32.totalorder %s628_s29, %s471_s8  ;;  %p474_p1 = scmp.lt.s32.totalorder %s472_s9, %s466_s6 }
  0x1e   : > { %p468_p12 = pnand %p467_p11, %p597_p5 }
  0x1f   : > { %296 = vperm.xlu0 %464, %v294_v5   ;;  %p475_p2 = por %p474_p1, %p473_p0 }
  0x20   : > { %p469_p13 = pneg %p468_p12 }
  0x22   : > { %p476_p3 = pnand %p475_p2, %p469_p13 }
  0x9a   : > { %v235_v8 = vpop.permute.xlu0 %234 }
  0x9b   : > { %vm236_vm2 = vcmp.eq.s32.totalorder %v235_v8, %v232_v7 }
  0x9c   : > { %v407_v9 = vsel %vm236_vm2, 1.0, %v531_v1 }
  0x9d   : > { %v239_v10 = vpack.c.bf16 %v407_v9, %v407_v9 }
  0x9e   : > { %v297_v11 = vpop.permute.xlu0 %296 }
  0x9f   : > { %419 = vmatmul.mubr.msk.bf16.vlgmr.msra.gmra.mrb[0].mxu0 %vm248_vm3, %v239_v10  ;;  %vm298_vm4 = vcmp.eq.s32.totalorder %v297_v11, 1 }
  0xa0   : > { %vm299_vm5 = vmpackc.low %vm298_vm4, %vm298_vm4 }
 0x172   : > { %v286_v12 = vpop.f32.mrb[0].mxu0 }
 0x173   : > { %v292_v14 = vpack.c.bf16 %v286_v12, %v286_v12  ;;  %v420_v15 = vpop.f32.mrb[1].mxu0 }
 0x174   : > { %v289_v16 = vpop.f32.mrb[2].mxu0 }
 0x175   : > { %v421_v17 = vpop.f32.mrb[3].mxu0  ;;  %v300_v18 = vsel %vm299_vm5, %v292_v14, %v293_v13 }
 0x176   : > { %301 = vst [vmem:[%s214_s28] sm:$0xf] %v300_v18 }
 0x177   : > { %479 = shalt.err (!%p476_p3)
}
 0x178   : > { %s480_s10 = scalar_lea.hbm %s626_s27, 64  ;;  %s484_s13 = scalar_lea.hbm %s672_s4, 192 }
 0x179   : > { %p481_p4 = scmp.ne.s32.totalorder %s626_s27, %s480_s10  ;;  %p485_p9 = scmp.lt.u32.totalorder %s626_s27, %s672_s4 }
 0x17a   : > { %p486_p10 = scmp.lt.u32.totalorder %s484_s13, %s480_s10  ;;  %p488_p12 = scmp.lt.u32.totalorder %s480_s10, %s626_s27 }
 0x17b   : > { %p482_p7 = pnand %p481_p4, %p597_p5 }
 0x17c   : > { %p487_p11 = por %p486_p10, %p485_p9 }
 0x17d   : > { %p483_p8 = pneg %p482_p7 }
 0x17e   : > { %p489_p13 = por %p488_p12, %p487_p11 }
 0x180   : > { %p490_p0 = pnand %p489_p13, %p483_p8 }
 0x182   : > { %493 = shalt.err (!%p490_p0)
}
 0x183   : > { %422 = dma.vmem_to_hbm [thread:$0]  (%p597_p5), %s628_s29, 64, %s626_s27, %s303_s19  }
 0x184 PF: > { %p428_p1 = scmp.ge.s32.totalorder %s528_s18, 2  ;;  %s328_s22 = sand.u32 1, %s516_s15  }
 0x185   : > { %s329_s23 = scalar_lea.sflag [#allocation3], %s328_s22 }
 0x186   : > { %p425_p2 = pnand %p428_p1, %p601_p6 }
 0x188   : > { %511 = dma.done.wait (!%p425_p2), %s329_s23, 64  }
 0x189   : > { %513 = vsyncadd (!%p425_p2), %s329_s23, 4294967232  ;;  %p14_p3 = scmp.ge.s32.totalorder %s584_s21, 5   ;;  %s675_s15 = smov %s520_s16 }
 0x18a   : > { %s676_s16 = smov %s524_s17  ;;  %s677_s17 = smov %s595_s24 }
 0x18b   : > { %s678_s18 = smov %s584_s21  ;;  %16 = sbr.rel (!%p14_p3) target bundleno = 3 (0x3), region = 77 }
 0x192   :  { %334 = vsyncpa [#allocation3], 1 }
 0x193   :  { %336 = vsyncpa [#allocation3 + $0x1], 1 }

// kernel: forward.2
= control target key start
LH: loop header
LB: loop body
LE: loop exit
PB: predicated region body
PF: predicated region fallthrough
CT: control target
= control target key end

     0   :  { %vm81_vm0 = vcmask 1045504   ;;  %vm68_vm1 = vcmask 97280   ;;  %vm1173_vm2 = vmmov 0   ;;  %s1481_s1 = inlined_call_operand.vmem [shape: bf16[12,128], index: 1, kind: input, shape index: {}]   ;;  %s1482_s0 = inlined_call_operand.vmem [shape: bf16[64,12], index: 0, kind: input, shape index: {}]   ;;  %s1483_s2 = inlined_call_operand.vmem [shape: f32[1,128], index: 2, kind: input, shape index: {}]   ;;  %s1484_s4 = inlined_call_operand.vmem [shape: bf16[512,128], index: 4, kind: input, shape index: {}]   ;;  %s1485_s5 = inlined_call_operand.vmem [shape: bf16[128,128], index: 5, kind: input, shape index: {}]   ;;  %s1486_s3 = inlined_call_operand.vmem [shape: f32[1,128], index: 3, kind: input, shape index: {}]   ;;  %s1487_s7 = inlined_call_operand.vmem [shape: bf16[128,128], index: 7, kind: input, shape index: {}]   ;;  %s1488_s6 = inlined_call_operand.vmem [shape: f32[1,128], index: 6, kind: input, shape index: {}]   ;;  %s1489_s8 = inlined_call_operand.vmem [shape: f32[1,128], index: 8, kind: input, shape index: {}]   ;;  %s1490_s9 = inlined_call_operand.vmem [shape: bf16[16,128], index: 9, kind: output, shape index: {}]  }
   0x1   :  { %v1083_v0 = vld [vmem:[%s1481_s1] sm:$0x3f]   ;;  %v1085_v3 = vld [vmem:[%s1482_s0 + $0x8] sm:$0xff]   ;;  %v1086_v4 = vld [vmem:[%s1482_s0 + $0x10] sm:$0xff]  }
   0x2   :  { %v1084_v1 = vld [vmem:[%s1482_s0] sm:$0xff]   ;;  %1080 = vmatprep.subr.msk.bf16.mxu0 %vm81_vm0, %v1083_v0  ;;  %v83_v2 = vsel %vm81_vm0, %v1083_v0, 0  ;;  %v1087_v5 = vld [vmem:[%s1482_s0 + $0x18] sm:$0xff]  }
   0x3   :  { %1031 = vmatpush3.bf16.msra.mxu0 %v83_v2  ;;  %1032 = vmatprep.mubr.msk.bf16.mxu0 %vm68_vm1, %v1084_v1  ;;  %v902_v44 = vld [vmem:[%s1483_s2] ss:$0 sm:$0xff] }
   0x6   :  { %1033 = vmatmul.mubr.msk.bf16.vlgmr.msra.gmra.mrb[0].mxu0 %vm68_vm1, %v1085_v3 }
   0x7   :  { %1036 = vmatprep.mubr.msk.bf16.mxu0 %vm68_vm1, %v1086_v4 }
   0xe   :  { %1037 = vmatmul.mubr.msk.bf16.gmra.mrb[4].mxu0 %vm68_vm1, %v1087_v5 }
  0xd9   :  { %v1034_v6 = vpop.f32.mrb[0].mxu0 }
  0xda   :  { %v119_v7 = vpop.f32.mrb[1].mxu0  ;;  %v152_v8 = vmul.f32 %v1034_v6, %v1034_v6 }
  0xdb   :  { %v1239_v9 = vpop.f32.mrb[2].mxu0  ;;  %v150_v12 = vmul.f32 %v119_v7, %v119_v7 }
  0xdc   :  { %162 = vadd.xlane.f32.xlu0 %v152_v8  ;;  %v1241_v10 = vpop.f32.mrb[3].mxu0  ;;  %v153_v15 = vmul.f32 %v1239_v9, %v1239_v9 }
  0xdd   :  { %v151_v11 = vmul.f32 %v1241_v10, %v1241_v10 }
  0xdf   :  { %160 = vadd.xlane.f32.xlu1 %v151_v11 }
  0xe0   :  { %158 = vadd.xlane.f32.xlu0 %v150_v12 }
  0xe1   :  { %v1038_v13 = vpop.f32.mrb[4].mxu0 }
  0xe2   :  { %v1245_v14 = vpop.f32.mrb[5].mxu0  ;;  %v156_v16 = vmul.f32 %v1038_v13, %v1038_v13 }
  0xe3   :  { %v1249_v17 = vpop.f32.mrb[6].mxu0  ;;  %v154_v19 = vmul.f32 %v1245_v14, %v1245_v14 }
  0xe4   :  { %164 = vadd.xlane.f32.xlu0 %v153_v15  ;;  %170 = vadd.xlane.f32.xlu1 %v156_v16  ;;  %v1251_v18 = vpop.f32.mrb[7].mxu0  ;;  %v157_v20 = vmul.f32 %v1249_v17, %v1249_v17  ;;  %v1089_v15 = vld [vmem:[%s1484_s4] sm:$0xff]  }
  0xe5   :  { %v155_v21 = vmul.f32 %v1251_v18, %v1251_v18 }
  0xe8   :  { %166 = vadd.xlane.f32.xlu0 %v154_v19  ;;  %172 = vadd.xlane.f32.xlu1 %v157_v20  ;;  %v1092_v19 = vld [vmem:[%s1484_s4 + $0x50] sm:$0xff]   ;;  %v1093_v20 = vld [vmem:[%s1484_s4 + $0xc0] sm:$0xff]  }
  0xe9   :  { %990 = vmatprep.subr.bf16.mxu0 %v1093_v20 }
  0xec   :  { %168 = vadd.xlane.f32.xlu1 %v155_v21  ;;  %v1094_v21 = vld [vmem:[%s1484_s4 + $0x10] sm:$0xff]  }
 0x169   :  { %v163_v22 = vpop.xlane.xlu0 %162 }
 0x16a   :  { %v177_v23 = vmul.f32 0.0078125, %v163_v22  ;;  %v1095_v22 = vld [vmem:[%s1484_s4 + $0x80] sm:$0xff]  }
 0x16b   :  { %991 = vmatpush3.bf16.msra.mxu0 %v1095_v22 }
 0x16c   :  { %v185_v24 = vadd.f32 1e-05, %v177_v23  ;;  %v161_v25 = vpop.xlane.xlu1 %160  ;;  %v1096_v23 = vld [vmem:[%s1484_s4 + $0x58] sm:$0xff]  }
 0x16d   :  { %v176_v26 = vmul.f32 0.0078125, %v161_v25  ;;  %v159_v27 = vpop.xlane.xlu0 %158  ;;  %v1098_v25 = vld [vmem:[%s1484_s4 + $0x18] sm:$0xff]  }
 0x16e   :  { %1136 = vrsqrt.f32 %v185_v24  ;;  %v175_v28 = vmul.f32 0.0078125, %v159_v27  ;;  %v1097_v24 = vld [vmem:[%s1484_s4 + $0xc8] sm:$0xff]   ;;  %v1100_v27 = vld [vmem:[%s1484_s4 + $0x60] sm:$0xff]  }
 0x16f   :  { %v184_v29 = vadd.f32 1e-05, %v176_v26  ;;  %v1099_v26 = vld [vmem:[%s1484_s4 + $0x88] sm:$0xff]   ;;  %992 = vmatprep.subr.bf16.mxu0 %v1097_v24 }
 0x170   :  { %v183_v30 = vadd.f32 1e-05, %v175_v28  ;;  %993 = vmatpush3.bf16.msra.mxu0 %v1099_v26  ;;  %v1101_v28 = vld [vmem:[%s1484_s4 + $0xd0] sm:$0xff]  }
 0x171   :  { %v165_v31 = vpop.xlane.xlu0 %164  ;;  %v171_v32 = vpop.xlane.xlu1 %170  ;;  %994 = vmatprep.subr.bf16.mxu0 %v1101_v28 }
 0x172   :  { %1138 = vrsqrt.f32 %v183_v30  ;;  %v178_v33 = vmul.f32 0.0078125, %v165_v31  ;;  %v181_v34 = vmul.f32 0.0078125, %v171_v32  ;;  %v1103_v30 = vld [vmem:[%s1484_s4 + $0x90] sm:$0xff]   ;;  %v1104_v31 = vld [vmem:[%s1484_s4 + $0x68] sm:$0xff]   ;;  %v1105_v32 = vld [vmem:[%s1484_s4 + $0xd8] sm:$0xff]  }
 0x173   :  { %1140 = vrsqrt.f32 %v184_v29  ;;  %v1102_v29 = vld [vmem:[%s1484_s4 + $0x20] sm:$0xff]  }
 0x174   :  { %v186_v35 = vadd.f32 1e-05, %v178_v33  ;;  %v189_v36 = vadd.f32 1e-05, %v181_v34  ;;  %995 = vmatpush3.bf16.msra.mxu0 %v1103_v30  ;;  %v1106_v33 = vld [vmem:[%s1484_s4 + $0x28] sm:$0xff]   ;;  %v1107_v34 = vld [vmem:[%s1484_s4 + $0x98] sm:$0xff]  }
 0x175   :  { %v167_v37 = vpop.xlane.xlu0 %166  ;;  %v173_v38 = vpop.xlane.xlu1 %172  ;;  %996 = vmatprep.subr.bf16.mxu0 %v1105_v32 }
 0x176   :  { %1142 = vrsqrt.f32 %v186_v35  ;;  %v179_v39 = vmul.f32 0.0078125, %v167_v37  ;;  %v182_v40 = vmul.f32 0.0078125, %v173_v38  ;;  %v1108_v35 = vld [vmem:[%s1484_s4 + $0x70] sm:$0xff]   ;;  %v1111_v38 = vld [vmem:[%s1484_s4 + $0xa0] sm:$0xff]  }
 0x177   :  { %1144 = vrsqrt.f32 %v189_v36  ;;  %v1109_v36 = vld [vmem:[%s1484_s4 + $0xe0] sm:$0xff]   ;;  %v1110_v37 = vld [vmem:[%s1484_s4 + $0x30] sm:$0xff]  }
 0x178   :  { %v1137_v41 = vpop.eup %1136  ;;  %v187_v42 = vadd.f32 1e-05, %v179_v39  ;;  %v190_v43 = vadd.f32 1e-05, %v182_v40  ;;  %997 = vmatpush3.bf16.msra.mxu0 %v1107_v34  ;;  %v1112_v39 = vld [vmem:[%s1484_s4 + $0x78] sm:$0xff]   ;;  %v1113_v40 = vld [vmem:[%s1484_s4 + $0xe8] sm:$0xff]  }
 0x179   :  { %v169_v45 = vpop.xlane.xlu1 %168  ;;  %v201_v46 = vmul.f32 %v1137_v41, %v1034_v6  ;;  %998 = vmatprep.subr.bf16.mxu0 %v1109_v36  ;;  %v1114_v41 = vld [vmem:[%s1484_s4 + $0x38] sm:$0xff]  }
 0x17a   :  { %1146 = vrsqrt.f32 %v187_v42  ;;  %v180_v47 = vmul.f32 0.0078125, %v169_v45  ;;  %v1115_v42 = vld [vmem:[%s1484_s4 + $0xa8] sm:$0xff]   ;;  %v1118_v45 = vld [vmem:[%s1484_s4 + $0xf8] sm:$0xff]  }
 0x17b   :  { %1148 = vrsqrt.f32 %v190_v43  ;;  %v1262_v48 = vmul.f32 %v902_v44, %v201_v46  ;;  %v1116_v43 = vld [vmem:[%s1484_s4 + $0xf0] sm:$0xff]   ;;  %v1119_v46 = vld [vmem:[%s1484_s4 + $0xb8] sm:$0xff]  }
 0x17c   :  { %v1139_v49 = vpop.eup %1138  ;;  %v188_v50 = vadd.f32 1e-05, %v180_v47  ;;  %999 = vmatpush3.bf16.msra.mxu0 %v1111_v38  ;;  %v1172_v47 = vmov 0.0  }
 0x17d   :  { %v224_v51 = vmul.f32 %v1262_v48, %v1262_v48  ;;  %v199_v52 = vmul.f32 %v1139_v49, %v119_v7  ;;  %v1141_v53 = vpop.eup %1140  ;;  %1000 = vmatprep.subr.bf16.mxu0 %v1113_v40 }
 0x17e   :  { %1150 = vrsqrt.f32 %v188_v50  ;;  %v200_v59 = vmul.f32 %v1141_v53, %v1241_v10 }
 0x17f   :  { %234 = vadd.xlane.f32.xlu0 %v224_v51  ;;  %v1266_v54 = vmul.f32 %v902_v44, %v199_v52 }
 0x180   :  { %v1143_v55 = vpop.eup %1142  ;;  %v1279_v3 = vmul.f32 %v902_v44, %v200_v59  ;;  %1001 = vmatpush3.bf16.msra.mxu0 %v1115_v42  ;;  %v1125_v42 = vld [vmem:[%s1485_s5 + $0x28] sm:$0xff]  }
 0x181   :  { %v1145_v56 = vpop.eup %1144  ;;  %v222_v57 = vmul.f32 %v1266_v54, %v1266_v54  ;;  %v202_v58 = vmul.f32 %v1143_v55, %v1239_v9  ;;  %1002 = vmatprep.subr.bf16.mxu0 %v1116_v43  ;;  %v1126_v43 = vld [vmem:[%s1485_s5 + $0x30] sm:$0xff]  }
 0x182   :  { %v205_v60 = vmul.f32 %v1145_v56, %v1038_v13  ;;  %v223_v9 = vmul.f32 %v1279_v3, %v1279_v3 }
 0x183   :  { %230 = vadd.xlane.f32.xlu0 %v222_v57  ;;  %v1272_v61 = vmul.f32 %v902_v44, %v202_v58 }
 0x184   :  { %v1147_v62 = vpop.eup %1146  ;;  %v1274_v63 = vmul.f32 %v902_v44, %v205_v60 }
 0x185   :  { %v1149_v0 = vpop.eup %1148  ;;  %v225_v1 = vmul.f32 %v1272_v61, %v1272_v61  ;;  %v203_v2 = vmul.f32 %v1147_v62, %v1245_v14  ;;  %v1088_v14 = vld [vmem:[%s1484_s4 + $0x40] sm:$0xff]  }
 0x186   :  { %v228_v4 = vmul.f32 %v1274_v63, %v1274_v63  ;;  %v206_v5 = vmul.f32 %v1149_v0, %v1249_v17  ;;  %968 = vmatprep.subr.bf16.mxu1 %v1088_v14  ;;  %v1090_v17 = vld [vmem:[%s1484_s4 + $0x48] sm:$0xff]  }
 0x187   :  { %236 = vadd.xlane.f32.xlu1 %v225_v1  ;;  %v1284_v6 = vmul.f32 %v902_v44, %v203_v2  ;;  %969 = vmatpush3.bf16.msra.mxu1 %v1089_v15 }
 0x188   :  { %v1151_v7 = vpop.eup %1150  ;;  %242 = vadd.xlane.f32.xlu0 %v228_v4  ;;  %v1290_v10 = vmul.f32 %v902_v44, %v206_v5  ;;  %970 = vmatprep.subr.bf16.mxu1 %v1090_v17 }
 0x189   :  { %v226_v8 = vmul.f32 %v1284_v6, %v1284_v6  ;;  %v204_v11 = vmul.f32 %v1151_v7, %v1251_v18  ;;  %v1091_v18 = vld [vmem:[%s1484_s4 + $0x8] sm:$0xff]  }
 0x18a   :  { %v229_v12 = vmul.f32 %v1290_v10, %v1290_v10 }
 0x18b   :  { %232 = vadd.xlane.f32.xlu1 %v223_v9  ;;  %v1295_v13 = vmul.f32 %v902_v44, %v204_v11  ;;  %971 = vmatpush3.bf16.msra.mxu1 %v1091_v18  ;;  %v1117_v44 = vld [vmem:[%s1484_s4 + $0xb0] sm:$0xff]  }
 0x18c   :  { %238 = vadd.xlane.f32.xlu0 %v226_v8  ;;  %972 = vmatprep.subr.bf16.mxu1 %v1092_v19  ;;  %v903_v19 = vld [vmem:[%s1486_s3] ss:$0 sm:$0xff] }
 0x18d   :  { %v227_v16 = vmul.f32 %v1295_v13, %v1295_v13  ;;  %1003 = vmatpush3.bf16.msra.mxu0 %v1117_v44  ;;  %v1127_v44 = vld [vmem:[%s1485_s5 + $0x38] sm:$0xff]  }
 0x18e   :  { %1004 = vmatprep.subr.bf16.mxu0 %v1118_v45 }
 0x18f   :  { %244 = vadd.xlane.f32.xlu1 %v229_v12  ;;  %973 = vmatpush3.bf16.msra.mxu1 %v1094_v21 }
 0x190   :  { %974 = vmatprep.subr.bf16.mxu1 %v1096_v23 }
 0x191   :  { %1005 = vmatpush3.bf16.msra.mxu0 %v1119_v46 }
 0x192   :  { %1060 = vmatprep.subr.bf16.mxu0 %v1172_v47 }
 0x193   :  { %240 = vadd.xlane.f32.xlu1 %v227_v16  ;;  %975 = vmatpush3.bf16.msra.mxu1 %v1098_v25 }
 0x194   :  { %976 = vmatprep.subr.bf16.mxu1 %v1100_v27 }
 0x197   :  { %977 = vmatpush3.bf16.msra.mxu1 %v1102_v29 }
 0x198   :  { %978 = vmatprep.subr.bf16.mxu1 %v1104_v31 }
 0x19b   :  { %979 = vmatpush3.bf16.msra.mxu1 %v1106_v33 }
 0x19c   :  { %980 = vmatprep.subr.bf16.mxu1 %v1108_v35 }
 0x19f   :  { %981 = vmatpush3.bf16.msra.mxu1 %v1110_v37  ;;  %v1121_v37 = vld [vmem:[%s1485_s5 + $0x8] sm:$0xff]  }
 0x1a0   :  { %982 = vmatprep.subr.bf16.mxu1 %v1112_v39 }
 0x1a3   :  { %983 = vmatpush3.bf16.msra.mxu1 %v1114_v41  ;;  %v1124_v41 = vld [vmem:[%s1485_s5 + $0x20] sm:$0xff]  }
 0x1a4   :  { %1040 = vmatprep.subr.bf16.mxu1 %v1172_v47 }
 0x20c   :  { %v235_v49 = vpop.xlane.xlu0 %234 }
 0x20d   :  { %v248_v50 = vmul.f32 0.0078125, %v235_v49 }
 0x20f   :  { %v256_v52 = vadd.f32 1e-05, %v248_v50 }
 0x210   :  { %v231_v51 = vpop.xlane.xlu0 %230 }
 0x211   :  { %v246_v53 = vmul.f32 0.0078125, %v231_v51  ;;  %1152 = vrsqrt.f32 %v256_v52 }
 0x213   :  { %v254_v55 = vadd.f32 1e-05, %v246_v53 }
 0x214   :  { %v237_v56 = vpop.xlane.xlu1 %236 }
 0x215   :  { %v243_v57 = vpop.xlane.xlu0 %242  ;;  %v249_v58 = vmul.f32 0.0078125, %v237_v56  ;;  %1154 = vrsqrt.f32 %v254_v55 }
 0x216   :  { %v252_v59 = vmul.f32 0.0078125, %v243_v57 }
 0x217   :  { %v257_v60 = vadd.f32 1e-05, %v249_v58 }
 0x218   :  { %v260_v62 = vadd.f32 1e-05, %v252_v59  ;;  %v233_v0 = vpop.xlane.xlu1 %232 }
 0x219   :  { %1156 = vrsqrt.f32 %v257_v60  ;;  %v239_v1 = vpop.xlane.xlu0 %238  ;;  %v247_v2 = vmul.f32 0.0078125, %v233_v0 }
 0x21a   :  { %v250_v4 = vmul.f32 0.0078125, %v239_v1  ;;  %1158 = vrsqrt.f32 %v260_v62  ;;  %v1128_v1 = vld [vmem:[%s1487_s7] sm:$0xff]  }
 0x21b   :  { %v255_v5 = vadd.f32 1e-05, %v247_v2  ;;  %v1153_v11 = vpop.eup %1152  ;;  %v1129_v2 = vld [vmem:[%s1487_s7 + $0x8] sm:$0xff]  }
 0x21c   :  { %v258_v7 = vadd.f32 1e-05, %v250_v4  ;;  %v245_v8 = vpop.xlane.xlu1 %244  ;;  %v272_v17 = vmul.f32 %v1153_v11, %v1262_v48  ;;  %v1130_v4 = vld [vmem:[%s1487_s7 + $0x10] sm:$0xff]   ;;  %v1135_v11 = vld [vmem:[%s1487_s7 + $0x38] sm:$0xff]  }
 0x21d   :  { %1160 = vrsqrt.f32 %v255_v5  ;;  %v253_v9 = vmul.f32 0.0078125, %v245_v8  ;;  %v1131_v5 = vld [vmem:[%s1487_s7 + $0x18] sm:$0xff]   ;;  %v1133_v8 = vld [vmem:[%s1487_s7 + $0x28] sm:$0xff]  }
 0x21e   :  { %1162 = vrsqrt.f32 %v258_v7  ;;  %v287_v23 = vmul.f32 %v903_v19, %v272_v17  ;;  %v1132_v7 = vld [vmem:[%s1487_s7 + $0x20] sm:$0xff]  }
 0x21f   :  { %v261_v12 = vadd.f32 1e-05, %v253_v9  ;;  %v1155_v16 = vpop.eup %1154  ;;  %v1134_v9 = vld [vmem:[%s1487_s7 + $0x30] sm:$0xff]  }
 0x220   :  { %v241_v14 = vpop.xlane.xlu1 %240  ;;  %v270_v25 = vmul.f32 %v1155_v16, %v1266_v54 }
 0x221   :  { %1164 = vrsqrt.f32 %v261_v12  ;;  %v251_v15 = vmul.f32 0.0078125, %v241_v14  ;;  %v936_v12 = vld [vmem:[%s1488_s6] ss:$0 sm:$0xff] }
 0x222   :  { %v285_v48 = vmul.f32 %v903_v19, %v270_v25 }
 0x223   :  { %v1157_v18 = vpop.eup %1156  ;;  %v259_v20 = vadd.f32 1e-05, %v251_v15 }
 0x224   :  { %v273_v21 = vmul.f32 %v1157_v18, %v1272_v61  ;;  %v1159_v22 = vpop.eup %1158  ;;  %v1120_v61 = vld [vmem:[%s1485_s5] sm:$0xff]  }
 0x225   :  { %1166 = vrsqrt.f32 %v259_v20  ;;  %v276_v31 = vmul.f32 %v1159_v22, %v1274_v63 }
 0x226   :  { %v288_v24 = vmul.f32 %v903_v19, %v273_v21 }
 0x227   :  { %v1161_v26 = vpop.eup %1160  ;;  %v291_v35 = vmul.f32 %v903_v19, %v276_v31 }
 0x228   :  { %v294_v27 = vpack.c.bf16 %v288_v24, %v287_v23  ;;  %v271_v28 = vmul.f32 %v1161_v26, %v1279_v3  ;;  %v1163_v29 = vpop.eup %1162 }
 0x229   :  { %v274_v54 = vmul.f32 %v1163_v29, %v1284_v6  ;;  %v1122_v6 = vld [vmem:[%s1485_s5 + $0x10] sm:$0xff]  }
 0x22a   :  { %585 = vmatprep.mubr.bf16.mxu1 %v294_v27  ;;  %v286_v30 = vmul.f32 %v903_v19, %v271_v28 }
 0x22b   :  { %v1165_v32 = vpop.eup %1164  ;;  %v289_v39 = vmul.f32 %v903_v19, %v274_v54 }
 0x22c   :  { %v293_v33 = vpack.c.bf16 %v286_v30, %v285_v48  ;;  %v277_v34 = vmul.f32 %v1165_v32, %v1290_v10 }
 0x22e   :  { %586 = vmatmul.mubr.bf16.vlgmr.msra.gmra.mrb[0].mxu1 %v293_v33  ;;  %v292_v36 = vmul.f32 %v903_v19, %v277_v34 }
 0x22f   :  { %v1167_v3 = vpop.eup %1166  ;;  %1041 = vmatpush3.bf16.msra.mxu1 %v1120_v61  ;;  %1056 = vmatprep.mubr.msk.bf16.mxu1 %vm1173_vm2, %v1172_v47 }
 0x230   :  { %v275_v63 = vmul.f32 %v1167_v3, %v1295_v13  ;;  %v296_v38 = vpack.c.bf16 %v292_v36, %v291_v35  ;;  %1042 = vmatprep.subr.bf16.mxu1 %v1172_v47  ;;  %v1123_v13 = vld [vmem:[%s1485_s5 + $0x18] sm:$0xff]   ;;  %v945_v35 = vld [vmem:[%s1489_s8] ss:$0 sm:$0xff] }
 0x232   :  { %v290_v40 = vmul.f32 %v903_v19, %v275_v63  ;;  %626 = vmatprep.mubr.bf16.mxu0 %v296_v38 }
 0x233   :  { %1043 = vmatpush3.bf16.msra.mxu1 %v1121_v37 }
 0x234   :  { %v295_v10 = vpack.c.bf16 %v290_v40, %v289_v39  ;;  %1044 = vmatprep.subr.bf16.mxu1 %v1172_v47 }
 0x236   :  { %627 = vmatmul.mubr.bf16.vlgmr.msra.gmra.mrb[8].mxu0 %v295_v10 }
 0x237   :  { %1045 = vmatpush3.bf16.msra.mxu1 %v1122_v6  ;;  %1076 = vmatprep.mubr.msk.bf16.mxu0 %vm1173_vm2, %v1172_v47 }
 0x238   :  { %1046 = vmatprep.subr.bf16.mxu1 %v1172_v47  ;;  %1061 = vmatpush3.bf16.msra.mxu0 %v1128_v1 }
 0x239   :  { %1062 = vmatprep.subr.bf16.mxu0 %v1172_v47 }
 0x23b   :  { %1047 = vmatpush3.bf16.msra.mxu1 %v1123_v13 }
 0x23c   :  { %1048 = vmatprep.subr.bf16.mxu1 %v1172_v47  ;;  %1063 = vmatpush3.bf16.msra.mxu0 %v1129_v2 }
 0x23d   :  { %1064 = vmatprep.subr.bf16.mxu0 %v1172_v47 }
 0x23f   :  { %1049 = vmatpush3.bf16.msra.mxu1 %v1124_v41 }
 0x240   :  { %1050 = vmatprep.subr.bf16.mxu1 %v1172_v47  ;;  %1065 = vmatpush3.bf16.msra.mxu0 %v1130_v4 }
 0x241   :  { %1066 = vmatprep.subr.bf16.mxu0 %v1172_v47 }
 0x243   :  { %1051 = vmatpush3.bf16.msra.mxu1 %v1125_v42 }
 0x244   :  { %1052 = vmatprep.subr.bf16.mxu1 %v1172_v47  ;;  %1067 = vmatpush3.bf16.msra.mxu0 %v1131_v5 }
 0x245   :  { %1068 = vmatprep.subr.bf16.mxu0 %v1172_v47 }
 0x247   :  { %1053 = vmatpush3.bf16.msra.mxu1 %v1126_v43 }
 0x248   :  { %1054 = vmatprep.subr.bf16.mxu1 %v1172_v47  ;;  %1069 = vmatpush3.bf16.msra.mxu0 %v1132_v7 }
 0x249   :  { %1070 = vmatprep.subr.bf16.mxu0 %v1172_v47 }
 0x24b   :  { %1055 = vmatpush3.bf16.msra.mxu1 %v1127_v44 }
 0x24c   :  { %1071 = vmatpush3.bf16.msra.mxu0 %v1133_v8 }
 0x24d   :  { %1072 = vmatprep.subr.bf16.mxu0 %v1172_v47 }
 0x250   :  { %1073 = vmatpush3.bf16.msra.mxu0 %v1134_v9 }
 0x251   :  { %1074 = vmatprep.subr.bf16.mxu0 %v1172_v47 }
 0x254   :  { %1075 = vmatpush3.bf16.msra.mxu0 %v1135_v11 }
 0x301   :  { %v984_v45 = vpop.f32.mrb[0].mxu1 }
 0x302   :  { %v985_v46 = vpop.f32.mrb[1].mxu1 }
 0x303   :  { %v986_v49 = vadd.f32 %v985_v46, %v984_v45  ;;  %v987_v50 = vpop.f32.mrb[2].mxu1 }
 0x304   :  { %v988_v51 = vpop.f32.mrb[3].mxu1 }
 0x305   :  { %v989_v52 = vadd.f32 %v988_v51, %v987_v50 }
 0x309   :  { %v1006_v53 = vpop.f32.mrb[8].mxu0 }
 0x30a   :  { %v1007_v55 = vpop.f32.mrb[9].mxu0 }
 0x30b   :  { %v1008_v56 = vadd.f32 %v1007_v55, %v1006_v53  ;;  %v1009_v57 = vpop.f32.mrb[10].mxu0 }
 0x30c   :  { %v1010_v58 = vpop.f32.mrb[11].mxu0 }
 0x30d   :  { %v629_v59 = vadd.f32 %v1008_v56, %v986_v49  ;;  %v1011_v60 = vadd.f32 %v1010_v58, %v1009_v57 }
 0x30f   :  { %v632_v62 = vadd.f32 %v1011_v60, %v989_v52 }
 0x311   :  { %v635_v0 = vpack.c.bf16 %v632_v62, %v629_v59 }
 0x313   :  { %1057 = vmatmul.mubr.bf16.vlgmr.msra.gmra.mrb[4].mxu1 %v635_v0 }
 0x3e6   :  { %v741_v14 = vpop.f32.mrb[4].mxu1 }
 0x3e7   :  { %v742_v15 = vadd.f32 %v936_v12, %v741_v14  ;;  %v1058_v16 = vpop.f32.mrb[5].mxu1 }
 0x3e8   :  { %v744_v17 = vpop.f32.mrb[6].mxu1 }
 0x3e9   :  { %v748_v18 = vmul.f32 %v742_v15, %v742_v15  ;;  %v745_v19 = vadd.f32 %v936_v12, %v744_v17  ;;  %v1059_v20 = vpop.f32.mrb[7].mxu1 }
 0x3eb   :  { %v750_v21 = vmul.f32 %v748_v18, %v742_v15  ;;  %v749_v22 = vmul.f32 %v745_v19, %v745_v19 }
 0x3ed   :  { %v752_v23 = vmul.f32 0.044715, %v750_v21  ;;  %v751_v47 = vmul.f32 %v749_v22, %v745_v19 }
 0x3ef   :  { %v754_v24 = vadd.f32 %v752_v23, %v742_v15  ;;  %v753_v25 = vmul.f32 0.044715, %v751_v47 }
 0x3f1   :  { %v756_v26 = vmul.f32 0.7978846, %v754_v24  ;;  %v755_v27 = vadd.f32 %v753_v25, %v745_v19 }
 0x3f3   :  { %1168 = vtanh.f32 %v756_v26  ;;  %v757_v28 = vmul.f32 0.7978846, %v755_v27 }
 0x3f5   :  { %1170 = vtanh.f32 %v757_v28 }
 0x3fd   :  { %v1169_v29 = vpop.eup %1168 }
 0x3fe   :  { %v760_v48 = vadd.f32 1.0, %v1169_v29 }
 0x3ff   :  { %v1171_v30 = vpop.eup %1170 }
 0x400   :  { %v762_v31 = vmul.f32 0.5, %v760_v48  ;;  %v761_v32 = vadd.f32 1.0, %v1171_v30 }
 0x402   :  { %v763_v61 = vmul.f32 0.5, %v761_v32  ;;  %v764_v33 = vmul.f32 %v762_v31, %v742_v15 }
 0x404   :  { %v765_v34 = vmul.f32 %v763_v61, %v745_v19 }
 0x406   :  { %v766_v54 = vpack.c.bf16 %v765_v34, %v764_v33 }
 0x408   :  { %1077 = vmatmul.mubr.bf16.vlgmr.msra.gmra.mrb[12].mxu0 %v766_v54 }
 0x4db   :  { %v872_v36 = vpop.f32.mrb[12].mxu0 }
 0x4dc   :  { %v1078_v3 = vpop.f32.mrb[13].mxu0  ;;  %v873_v63 = vadd.f32 %v945_v35, %v872_v36 }
 0x4dd   :  { %v875_v37 = vpop.f32.mrb[14].mxu0 }
 0x4de   :  { %v876_v38 = vadd.f32 %v945_v35, %v875_v37  ;;  %v1079_v39 = vpop.f32.mrb[15].mxu0 }
 0x4e0   :  { %v961_v40 = vpack.c.bf16 %v876_v38, %v873_v63 }
 0x4e2   :  { %962 = vst [vmem:[%s1490_s9] sm:$0xff] %v961_v40  }

</bundles_post_ra>
